<compile_context>
chip_gen: v6e
topology: v6e:2x2x1
jax: 0.10.0
libtpu: 0.0.40
codegen_flags: <defaults>
</compile_context>

<pallas_src>
import jax
import jax.numpy as jnp
from jax.experimental import pallas as pl
from jax.experimental.pallas import tpu as pltpu

_LANES = 128


def _default_max_block_rows():
    """4 MiB f32 tiles on v7x (fast HBM -> amortize per-step overhead), 2 MiB otherwise."""
    try:
        kind = jax.devices()[0].device_kind.lower()
    except Exception:  # pragma: no cover - defensive; fall back to the safe size
        kind = ""
    return 8192 if "v7" in kind else 4096


def _row_pack(dtype):
    """Rows per packed sublane group: 8 for f32, 16 for bf16, 32 for int8/fp8."""
    itemsize = jnp.dtype(dtype).itemsize
    return max(8, 32 // max(1, itemsize))


def _round_up(v, m):
    return ((v + m - 1) // m) * m


def _choose_block_rows(rows, max_block_rows, dtype):
    """Pick the sublane extent of one tile (rows is the number of 128-lane rows)."""
    pack = _row_pack(dtype)
    max_block_rows = max(pack, (max_block_rows // pack) * pack)
    if rows > max_block_rows:
        # Large tensor: biggest tile in budget; grid already has >= 2 steps,
        # so pipelining / v7x megacore sharding come for free.
        return max_block_rows
    payload_bytes = rows * _LANES * jnp.dtype(dtype).itemsize
    if payload_bytes > (1 << 20) and rows > 2 * pack:
        # Mid-size: split into exactly 2 blocks so DMA/compute overlap and the
        # "parallel" grid axis can feed both v7x TensorCores. Never shrink more.
        return min(rows, _round_up(pl.cdiv(rows, 2), pack))
    # Small tensor: single full-extent block; per-step overhead would dominate.
    return rows


def _swish_kernel(beta_ref, x_ref, o_ref):
    # beta_ref: SMEM scalar (scalar prefetch); x_ref / o_ref: VMEM tiles.
    x = x_ref[...].astype(jnp.float32)
    beta = beta_ref[0]
    z = beta * x
    # Numerically stable sigmoid without a full-precision divide:
    #   e = exp(-|z|) in (0, 1]   (EUP slot)
    #   r ~= 1/(1+e) via approx reciprocal (EUP) + one Newton step (VPU only)
    e = jnp.exp(-jnp.abs(z))
    d = 1.0 + e
    r = pl.reciprocal(d, approx=True)
    r = r * (2.0 - d * r)                   # Newton refine -> ~f32 exact
    sig = jnp.where(z >= 0.0, r, e * r)     # sigmoid(beta * x)
    o_ref[...] = (x * sig).astype(o_ref.dtype)


def _swish_pallas_2d(x2d, beta_arr, block_rows, donate):
    rows = x2d.shape[0]
    grid = (pl.cdiv(rows, block_rows),)     # Pallas handles the ragged last block
    return pl.pallas_call(
        _swish_kernel,
        out_shape=jax.ShapeDtypeStruct((rows, _LANES), x2d.dtype),
        grid_spec=pltpu.PrefetchScalarGridSpec(
            num_scalar_prefetch=1,          # beta -> SMEM before the grid runs
            grid=grid,
            in_specs=[pl.BlockSpec((block_rows, _LANES), lambda i, beta: (i, 0))],
            out_specs=pl.BlockSpec((block_rows, _LANES), lambda i, beta: (i, 0)),
        ),
        compiler_params=pltpu.CompilerParams(
            # Single "parallel" axis: shards across TensorCores on v7x megacore;
            # harmless (sequential loop) on single-TC v5e/v6e.
            dimension_semantics=("parallel",),
            # Headroom for up to 4 MiB tiles with in+out double buffering.
            vmem_limit_bytes=32 * 1024 * 1024,
        ),
        # Optional inplace-style buffer donation (tensor input index 1 because
        # of the scalar-prefetch argument at index 0).
        input_output_aliases=({1: 0} if donate else {}),
    )(beta_arr, x2d)


def swish_pallas(x, beta=1.0, max_block_rows=None, donate=False):
    """Elementwise swish(x) = x * sigmoid(beta * x) on an arbitrary-shaped array."""
    orig_shape = x.shape
    dtype = x.dtype
    n = x.size
    if n == 0:
        return x
    if max_block_rows is None:
        max_block_rows = _default_max_block_rows()

    beta_f32 = jnp.asarray(beta, dtype=jnp.float32).reshape(())
    beta_arr = beta_f32.reshape((1,))

    x_flat = jnp.reshape(x, (-1,))
    aligned = (n // _LANES) * _LANES

    if aligned == 0:
        # Fewer than 128 elements: a kernel launch is pure overhead; let XLA fuse it.
        y = x_flat.astype(jnp.float32)
        out = (y * jax.nn.sigmoid(beta_f32 * y)).astype(dtype)
        return jnp.reshape(out, orig_shape)

    rows = aligned // _LANES
    head2d = jnp.reshape(x_flat[:aligned], (rows, _LANES))
    block_rows = _choose_block_rows(rows, max_block_rows, dtype)
    out_head = jnp.reshape(
        _swish_pallas_2d(head2d, beta_arr, block_rows, donate), (-1,)
    )

    if aligned == n:
        return jnp.reshape(out_head, orig_shape)

    # Ragged tail (< 128 elements): plain jnp (XLA fuses it). Avoids padding the
    # whole flattened tensor, which would add a full extra HBM pass.
    tail = x_flat[aligned:].astype(jnp.float32)
    out_tail = (tail * jax.nn.sigmoid(beta_f32 * tail)).astype(dtype)
    return jnp.reshape(jnp.concatenate([out_head, out_tail]), orig_shape)


class SwishJax:
    """JAX/Pallas mirror of the PyTorch Swish module (forward pass only).

    `inplace` has no meaning for immutable JAX arrays; pass donate=True to
    swish_pallas for the closest analogue.
    """

    # TODO(synk): no custom_vjp is defined for the pallas_call, so gradients
    # w.r.t. x / the trainable beta will not flow through this forward pass.
    def __init__(self, inplace=False, trainable=False):
        self.inplace = inplace
        if trainable:
            # deterministic init, matching torch.ones(1)
            self.beta = jnp.ones((1,), dtype=jnp.float32)

    def __call__(self, x):
        if hasattr(self, "beta"):
            return swish_pallas(x, beta=self.beta)
        return swish_pallas(x, beta=1.0)


if __name__ == "__main__":
    key = jax.random.PRNGKey(0)
    x = jax.random.normal(key, (2, 4, 16, 16), dtype=jnp.float32)  # NCHW

    # Non-trainable (beta = 1.0), single grid step.
    mod = SwishJax(trainable=False)
    out = jax.block_until_ready(mod(x))
    ref = x * jax.nn.sigmoid(x)
    assert out.shape == x.shape and out.dtype == x.dtype
    assert float(jnp.max(jnp.abs(out - ref))) < 1e-4

    # Trainable-beta variant (forward only).
    mod_t = SwishJax(trainable=True)
    out_t = jax.block_until_ready(mod_t(x))
    ref_t = x * jax.nn.sigmoid(mod_t.beta[0] * x)
    assert float(jnp.max(jnp.abs(out_t - ref_t))) < 1e-4

    # Multi-step grid path (force small tiles to exercise the pipelined grid).
    out_multi = jax.block_until_ready(swish_pallas(x, beta=1.0, max_block_rows=8))
    assert float(jnp.max(jnp.abs(out_multi - ref))) < 1e-4

    # Ragged numel (not a multiple of 128): aligned-prefix kernel + jnp tail.
    x_r = jax.random.normal(jax.random.PRNGKey(1), (2, 3, 7, 5), dtype=jnp.float32)
    out_r = jax.block_until_ready(swish_pallas(x_r, beta=0.75))
    ref_r = x_r * jax.nn.sigmoid(0.75 * x_r)
    assert out_r.shape == x_r.shape
    assert float(jnp.max(jnp.abs(out_r - ref_r))) < 1e-4

    # Tiny tensor (< 128 elements): pure-jnp fallback path.
    x_s = jax.random.normal(jax.random.PRNGKey(2), (2, 4, 3, 3), dtype=jnp.float32)
    out_s = jax.block_until_ready(swish_pallas(x_s, beta=1.25))
    ref_s = x_s * jax.nn.sigmoid(1.25 * x_s)
    assert float(jnp.max(jnp.abs(out_s - ref_s))) < 1e-4

    # bf16 input: f32 internal math, bf16 store (sublane pack of 16 respected).
    x_b = x.astype(jnp.bfloat16)
    out_b = jax.block_until_ready(swish_pallas(x_b, beta=1.0))
    ref_b = (x_b.astype(jnp.float32) * jax.nn.sigmoid(x_b.astype(jnp.float32)))
    assert out_b.dtype == jnp.bfloat16 and out_b.shape == x_b.shape
    assert float(jnp.max(jnp.abs(out_b.astype(jnp.float32) - ref_b))) < 5e-2

    print("KERNEL_OK")
</pallas_src>

<mosaic_0001>
module attributes {stable_mosaic.version = 11 : i64} {
  func.func @_swish_kernel(%arg0: i32, %arg1: memref<1xf32, #tpu.memory_space<smem>>, %arg2: memref<16x128xf32, #tpu.memory_space<vmem>>, %arg3: memref<16x128xf32, #tpu.memory_space<vmem>>) attributes {dimension_semantics = [#tpu.dimension_semantics<parallel>], iteration_bounds = array<i64: 1>, scalar_prefetch = 1 : i64, scratch_operands = 0 : i64, tpu.core_type = #tpu.core_type<tc>, window_params = [{transform_indices = @transform_0, window_bounds = array<i64: 16, 128>}, {transform_indices = @transform_1, window_bounds = array<i64: 16, 128>}]} {
    %c0 = arith.constant 0 : index
    %c0_0 = arith.constant 0 : index
    %0 = vector.load %arg2[%c0, %c0_0] : memref<16x128xf32, #tpu.memory_space<vmem>>, vector<16x128xf32>
    %c0_1 = arith.constant 0 : index
    %1 = memref.load %arg1[%c0_1] : memref<1xf32, #tpu.memory_space<smem>>
    %2 = vector.broadcast %1 : f32 to vector<16x128xf32>
    %3 = arith.mulf %2, %0 : vector<16x128xf32>
    %4 = math.absf %3 : vector<16x128xf32>
    %cst = arith.constant 0.000000e+00 : f32
    %5 = vector.broadcast %cst : f32 to vector<16x128xf32>
    %6 = arith.subf %5, %4 : vector<16x128xf32>
    %7 = math.exp %6 : vector<16x128xf32>
    %cst_2 = arith.constant 1.000000e+00 : f32
    %8 = vector.broadcast %cst_2 : f32 to vector<16x128xf32>
    %9 = arith.addf %8, %7 : vector<16x128xf32>
    %10 = tpu.reciprocal %9 {approx = true} : vector<16x128xf32> -> vector<16x128xf32>
    %11 = arith.mulf %9, %10 : vector<16x128xf32>
    %cst_3 = arith.constant 2.000000e+00 : f32
    %12 = vector.broadcast %cst_3 : f32 to vector<16x128xf32>
    %13 = arith.subf %12, %11 : vector<16x128xf32>
    %14 = arith.mulf %10, %13 : vector<16x128xf32>
    %cst_4 = arith.constant 0.000000e+00 : f32
    %15 = vector.broadcast %cst_4 : f32 to vector<16x128xf32>
    %16 = arith.cmpf oge, %3, %15 : vector<16x128xf32>
    %17 = arith.mulf %7, %14 : vector<16x128xf32>
    %18 = arith.select %16, %14, %17 : vector<16x128xi1>, vector<16x128xf32>
    %19 = arith.mulf %0, %18 : vector<16x128xf32>
    %c0_5 = arith.constant 0 : index
    %c0_6 = arith.constant 0 : index
    %20 = vector.load %arg3[%c0_5, %c0_6] : memref<16x128xf32, #tpu.memory_space<vmem>>, vector<16x128xf32>
    tpu.vector_store %arg3[%c0_5, %c0_6], %19 {strides = array<i32>} : memref<16x128xf32, #tpu.memory_space<vmem>>, vector<16x128xf32>,
    return
  }
  func.func @transform_0(%arg0: i32, %arg1: memref<1xf32, #tpu.memory_space<smem>>) -> (i32, i32) {
    %c0_i32 = arith.constant 0 : i32
    %c0_i32_0 = arith.constant 0 : i32
    return %arg0, %c0_i32 : i32, i32
  }
  func.func @transform_1(%arg0: i32, %arg1: memref<1xf32, #tpu.memory_space<smem>>) -> (i32, i32) {
    %c0_i32 = arith.constant 0 : i32
    %c0_i32_0 = arith.constant 0 : i32
    return %arg0, %c0_i32 : i32, i32
  }
}

</mosaic_0001>

<bundles_post_ra>
// kernel: tpu_custom_call.1
= control target key start
LH: loop header
LB: loop body
LE: loop exit
PB: predicated region body
PF: predicated region fallthrough
CT: control target
= control target key end

     0   :  { %8 = vsyncpa [#allocation5], 0  ;;  %s166_s0 = inlined_call_operand.<no memory space> [shape: f32[1], index: 0, kind: input, shape index: {}]   ;;  %s167_s1 = inlined_call_operand.hbm [shape: f32[16,128], index: 1, kind: input, shape index: {}]   ;;  %s168_s2 = inlined_call_operand.hbm [shape: f32[16,128], index: 2, kind: output, shape index: {}]  }
   0x1   :  { %9 = vsyncpa [#allocation6], 0  ;;  %s132_s9 = smov [#allocation4]  }
   0x2   :  { %s15_s10 = sshll.u32 %s132_s9, 4  ;;  %s16_s10 = int_to_ptr.vmem [resolvable:$true] %s15_s10 }
   0x3   :  { %s96_s11 = scalar_lea.vmem %s16_s10, 256  ;;  %p101_p1 = scmp.lt.s32.totalorder %s16_s10, %s16_s10 }
   0x4   :  { %p97_p0 = scmp.ne.s32.totalorder %s16_s10, %s96_s11  ;;  %p102_p2 = scmp.lt.s32.totalorder %s96_s11, %s96_s11 }
   0x6   :  { %p103_p3 = por %p102_p2, %p101_p1 }
   0x8   :  { %p104_p4 = pnand %p103_p3, %p97_p0 }
   0xa   :  { %107 = shalt.err (!%p104_p4)
}
   0xb   :  { %s133_s12 = smov 128   ;;  %s134_s13 = smov 8  }
   0xc   :  { %21 = dma.hbm_to_vmem [thread:$0]  %s167_s1, 256, %s16_s10, [#allocation5], %s133_s12, %s133_s12, %s134_s13  }
   0xd   :  { %128 = dma.done.wait [#allocation5], 256  }
   0xe   :  { %129 = vsyncadd [#allocation5], 4294967040  ;;  %v28_v0 = vstv %s166_s0  ;;  %v25_v1 = vld [vmem:[#allocation4] sm:$0xff]  ;;  %v26_v2 = vld [vmem:[#allocation4 + $0x8] sm:$0xff]  ;;  %s135_s0 = smov [#allocation7]  }
   0xf   :  { %v29_v3 = vmul.f32 %v28_v0, %v25_v1  ;;  %v30_v4 = vmul.f32 %v28_v0, %v26_v2  ;;  %s64_s1 = sshll.u32 %s135_s0, 4  ;;  %s65_s1 = int_to_ptr.vmem [resolvable:$true] %s64_s1 }
  0x10   :  { %s108_s18 = scalar_lea.vmem %s65_s1, 256  ;;  %p113_p6 = scmp.lt.s32.totalorder %s65_s1, %s65_s1 }
  0x11   :  { %v31_v5 = vand.u32 2147483647, %v29_v3  ;;  %v32_v6 = vand.u32 2147483647, %v30_v4  ;;  %vm49_vm0 = vcmp.ge.f32.partialorder %v29_v3, 0.0  ;;  %vm50_vm1 = vcmp.ge.f32.partialorder %v30_v4, 0.0  ;;  %p109_p5 = scmp.ne.s32.totalorder %s65_s1, %s108_s18  ;;  %p114_p7 = scmp.lt.s32.totalorder %s108_s18, %s108_s18 }
  0x13   :  { %v33_v7 = vsub.f32 0.0, %v31_v5  ;;  %v34_v8 = vsub.f32 0.0, %v32_v6  ;;  %p115_p8 = por %p114_p7, %p113_p6 }
  0x15   :  { %v35_v9 = vmul.f32 1.442695, %v33_v7  ;;  %v37_v10 = vmul.f32 1.442695, %v34_v8  ;;  %p116_p9 = pnand %p115_p8, %p109_p5 }
  0x17   :  { %80 = vpow2.f32 %v35_v9 }
  0x18   :  { %82 = vpow2.f32 %v37_v10 }
  0x24   :  { %v81_v11 = vpop.eup %80 }
  0x25   :  { %v83_v12 = vpop.eup %82  ;;  %v39_v13 = vadd.f32 1.0, %v81_v11 }
  0x26   :  { %v40_v14 = vadd.f32 1.0, %v83_v12 }
  0x27   :  { %84 = vrcp.f32 %v39_v13 }
  0x28   :  { %86 = vrcp.f32 %v40_v14 }
  0x34   :  { %v85_v15 = vpop.eup %84 }
  0x35   :  { %v87_v16 = vpop.eup %86  ;;  %v43_v17 = vmul.f32 %v85_v15, %v39_v13 }
  0x36   :  { %v44_v18 = vmul.f32 %v87_v16, %v40_v14 }
  0x37   :  { %v45_v19 = vsub.f32 2.0, %v43_v17 }
  0x38   :  { %v46_v20 = vsub.f32 2.0, %v44_v18 }
  0x39   :  { %v47_v21 = vmul.f32 %v85_v15, %v45_v19 }
  0x3a   :  { %v48_v22 = vmul.f32 %v87_v16, %v46_v20 }
  0x3b   :  { %v51_v23 = vmul.f32 %v81_v11, %v47_v21 }
  0x3c   :  { %v52_v24 = vmul.f32 %v83_v12, %v48_v22 }
  0x3d   :  { %v53_v25 = vsel %vm49_vm0, %v47_v21, %v51_v23 }
  0x3e   :  { %v55_v26 = vmul.f32 %v53_v25, %v25_v1  ;;  %v54_v27 = vsel %vm50_vm1, %v48_v22, %v52_v24 }
  0x3f   :  { %v56_v28 = vmul.f32 %v54_v27, %v26_v2 }
  0x40   :  { %57 = vst [vmem:[#allocation7] sm:$0xff] %v55_v26 }
  0x41   :  { %58 = vst [vmem:[#allocation7 + $0x8] sm:$0xff] %v56_v28 }
  0x42   :  { %119 = shalt.err (!%p116_p9)
}
  0x43   :  { %70 = dma.vmem_to_hbm [thread:$0]  %s65_s1, 256, %s168_s2, [#allocation6], %s133_s12, %s133_s12, %s134_s13  }
  0x44   :  { %130 = dma.done.wait [#allocation6], 256  }
  0x45   :  { %131 = vsyncadd [#allocation6], 4294967040 }
  0x46   :  { %74 = vsyncpa [#allocation5], 1 }
  0x47   :  { %75 = vsyncpa [#allocation6], 1 }

</bundles_post_ra>
